<compile_context>
chip_gen: v7x
topology: tpu7x:2x2x1
jax: 0.10.0
libtpu: 0.0.40
codegen_flags: <defaults>
</compile_context>

<pallas_src>
import functools

import jax
import jax.numpy as jnp
from jax.experimental import pallas as pl
from jax.experimental.pallas import tpu as pltpu

_LANE = 128


def _sublane_multiple(dtype):
    """Required sublane-tile multiple for a dtype: 8 (32-bit), 16 (16-bit), 32 (8-bit)."""
    return max(8, 32 // jnp.dtype(dtype).itemsize)


def _focal_loss_kernel(alpha_ref, probs_ref, tgt_ref, loss_ref, cnt_ref, *,
                       gamma, ignore_index, num_classes, hw_valid, t_sub,
                       probs_dtype):
    pid = pl.program_id(1)

    # Upcast the (small) target tile in-kernel so HBM traffic stays at the
    # caller's narrow dtype, but all compares are plain int32.
    tgt = tgt_ref[0].astype(jnp.int32)                       # (t_sub, 128)

    # Validity: flat pixel-index bound (covers the ragged row tile and any lane
    # tail without padding probs) AND ignore_index pixels.
    row_ids = jax.lax.broadcasted_iota(jnp.int32, tgt.shape, 0)
    lane_ids = jax.lax.broadcasted_iota(jnp.int32, tgt.shape, 1)
    flat = (pid * t_sub + row_ids) * _LANE + lane_ids
    valid = jnp.logical_and(flat < hw_valid, tgt != ignore_index)

    # Gather p_t = probs[target] and alpha_w = alpha[target] with per-class
    # selects (pure VPU, no one-hot / cross-lane work); alpha lives in SMEM.
    # Selects stay in the native probs dtype; single upcast after the loop.
    p_t = jnp.ones(tgt.shape, probs_dtype)
    a_w = jnp.zeros(tgt.shape, jnp.float32)
    for ci in range(num_classes):
        sel = tgt == ci
        p_t = jnp.where(sel, probs_ref[0, ci, :, :], p_t)
        a_w = jnp.where(sel, alpha_ref[ci], a_w)
    p_t = p_t.astype(jnp.float32)

    # torch.clamp + log; invalid pixels are pinned to p_t = 1 so they contribute
    # exactly 0 (and garbage out-of-bounds tail data can never produce NaN).
    p_t = jnp.where(valid, jnp.clip(p_t, 1e-10, 1.0), 1.0)
    ce = -jnp.log(p_t)
    one_m_pt = 1.0 - p_t        # pt = exp(-ce) == p_t exactly; skip the exp round-trip
    if gamma == 2.0:
        focal = one_m_pt * one_m_pt
    elif gamma == 1.0:
        focal = one_m_pt
    elif gamma == 0.0:
        focal = jnp.ones_like(one_m_pt)
    else:
        focal = jnp.power(one_m_pt, gamma)

    loss = jnp.where(valid, a_w * focal * ce, 0.0)
    cnt = valid.astype(jnp.float32)

    # Lane-dense (1, 128) partial sums per grid step (VPU vreg accumulation plus
    # one sublane reduce on the otherwise-idle XLU slot).
    loss_ref[0, 0] = jnp.sum(loss, axis=0, keepdims=True)
    cnt_ref[0, 0] = jnp.sum(cnt, axis=0, keepdims=True)


def _choose_row_tile(p_rows, num_classes, probs_itemsize, row_mult, n_batch,
                     max_block_bytes):
    """Pick the sublane-row tile: full extent if small, else a multiple of row_mult."""
    if p_rows <= row_mult:
        return p_rows
    budget_rows = max(row_mult,
                      max_block_bytes // (num_classes * _LANE * probs_itemsize))
    t = min(p_rows, budget_rows)
    if t < p_rows:
        t = max(row_mult, (t // row_mult) * row_mult)
    # Keep >= 2 grid steps when batch == 1 so both v7x TensorCores get work.
    if n_batch == 1 and pl.cdiv(p_rows, t) < 2 and p_rows >= 2 * row_mult:
        half = pl.cdiv(p_rows, 2)
        t = ((half + row_mult - 1) // row_mult) * row_mult
    return t


def focal_loss(softmax_probs, targets, alpha=None, *, gamma=2.0,
               ignore_index=-100, max_block_bytes=8 << 20):
    """softmax_probs: (N, C, H, W) f32/bf16; targets: (N, H, W) int8/16/32; alpha: (C,)."""
    n, c, h, w = softmax_probs.shape
    hw = h * w

    probs = softmax_probs
    if probs.dtype not in (jnp.dtype(jnp.float32), jnp.dtype(jnp.bfloat16)):
        probs = probs.astype(jnp.float32)   # keep bf16 narrow; never downcast f32 here

    tgt = targets
    if tgt.dtype not in (jnp.dtype(jnp.int8), jnp.dtype(jnp.int16),
                         jnp.dtype(jnp.int32)):
        tgt = tgt.astype(jnp.int32)
    if not (jnp.iinfo(tgt.dtype).min <= ignore_index <= jnp.iinfo(tgt.dtype).max):
        tgt = tgt.astype(jnp.int32)

    probs = probs.reshape(n, c, hw)
    tgt = tgt.reshape(n, hw)

    if hw % _LANE == 0:
        p_rows = hw // _LANE          # free reshape, no HBM pad pass
    else:
        # TODO(synk): ragged H*W tail still costs one HBM pad pass over probs; a
        # pad-free path needs an in-kernel sublane relayout that is slower than the pad.
        p_rows = pl.cdiv(hw, _LANE)
        pad = p_rows * _LANE - hw
        probs = jnp.pad(probs, ((0, 0), (0, 0), (0, pad)))
        tgt = jnp.pad(tgt, ((0, 0), (0, pad)))     # tail masked in-kernel anyway
    probs = probs.reshape(n, c, p_rows, _LANE)
    tgt = tgt.reshape(n, p_rows, _LANE)

    row_mult = max(_sublane_multiple(probs.dtype), _sublane_multiple(tgt.dtype))
    t_sub = _choose_row_tile(p_rows, c, probs.dtype.itemsize, row_mult, n,
                             max_block_bytes)
    n_tiles = pl.cdiv(p_rows, t_sub)

    if alpha is None:
        alpha_arr = jnp.ones((c,), jnp.float32)
    else:
        alpha_arr = jnp.asarray(alpha, jnp.float32).reshape(c)

    kernel = functools.partial(
        _focal_loss_kernel, gamma=float(gamma), ignore_index=int(ignore_index),
        num_classes=c, hw_valid=hw, t_sub=t_sub, probs_dtype=probs.dtype)

    # Tight VMEM accounting: double-buffered input blocks + tiny outputs + margin.
    probs_blk = c * t_sub * _LANE * probs.dtype.itemsize
    tgt_blk = t_sub * _LANE * tgt.dtype.itemsize
    out_blk = 2 * _LANE * 4
    vmem_need = 2 * (probs_blk + tgt_blk + 2 * out_blk) + (2 << 20)
    vmem_limit = int(min(40 << 20, max(vmem_need, 16 << 20)))

    loss_parts, cnt_parts = pl.pallas_call(
        kernel,
        out_shape=(jax.ShapeDtypeStruct((n, n_tiles, 1, _LANE), jnp.float32),
                   jax.ShapeDtypeStruct((n, n_tiles, 1, _LANE), jnp.float32)),
        grid_spec=pltpu.PrefetchScalarGridSpec(
            num_scalar_prefetch=0,
            grid=(n, n_tiles),
            in_specs=[
                pl.BlockSpec(memory_space=pltpu.MemorySpace.SMEM),        # alpha (C,)
                pl.BlockSpec((1, c, t_sub, _LANE), lambda i, j: (i, 0, j, 0)),
                pl.BlockSpec((1, t_sub, _LANE), lambda i, j: (i, j, 0)),
            ],
            out_specs=[
                pl.BlockSpec((1, 1, 1, _LANE), lambda i, j: (i, j, 0, 0)),
                pl.BlockSpec((1, 1, 1, _LANE), lambda i, j: (i, j, 0, 0)),
            ],
        ),
        compiler_params=pltpu.CompilerParams(
            dimension_semantics=("parallel", "parallel"),
            vmem_limit_bytes=vmem_limit),
    )(alpha_arr, probs, tgt)

    # Final tiny reduction + mean (sum / valid count) in plain JAX.  NB: if every
    # pixel is ignore_index this is 0/0 = NaN, same as the PyTorch reference.
    return jnp.sum(loss_parts) / jnp.sum(cnt_parts)


def _focal_loss_ref(softmax_probs, targets, alpha, gamma=2.0, ignore_index=-100):
    """Pure-JAX reference mirroring the PyTorch forward."""
    probs = jnp.clip(softmax_probs.astype(jnp.float32), 1e-10, 1.0)
    log_probs = jnp.log(probs)                                   # (N, C, H, W)
    tgt = targets.astype(jnp.int32)
    valid = tgt != ignore_index
    safe_tgt = jnp.where(valid, tgt, 0)
    ce = -jnp.take_along_axis(log_probs, safe_tgt[:, None, :, :], axis=1)[:, 0]
    pt = jnp.exp(-ce)
    loss = (1.0 - pt) ** gamma * ce
    loss = alpha[safe_tgt] * loss
    loss = jnp.where(valid, loss, 0.0)
    return jnp.sum(loss) / jnp.sum(valid.astype(jnp.float32))


if __name__ == "__main__":
    key = jax.random.PRNGKey(0)
    k_logits, k_tgt = jax.random.split(key)

    N, C, H, W = 2, 4, 16, 16
    logits = jax.random.normal(k_logits, (N, C, H, W), dtype=jnp.float32)
    softmax_probs = jax.nn.softmax(logits, axis=1)               # precomputed softmax
    targets = jax.random.randint(k_tgt, (N, H, W), 0, C, dtype=jnp.int32)
    # mark a few pixels as ignore_index to exercise the mask
    targets = targets.at[0, 0, :4].set(-100)

    # deterministic per-class alpha weights (the module's only "parameter")
    alpha = jnp.array([0.1, 0.2, 0.3, 0.4], dtype=jnp.float32)

    ref = _focal_loss_ref(softmax_probs, targets, alpha, gamma=2.0, ignore_index=-100)

    # f32 probs + int32 targets (reference path)
    out = focal_loss(softmax_probs, targets, alpha, gamma=2.0, ignore_index=-100)
    out = jax.block_until_ready(out)
    assert jnp.allclose(out, ref, rtol=1e-5, atol=1e-6), (out, ref)

    # int8 targets: no wrapper-side cast, upcast happens in-kernel
    out_i8 = focal_loss(softmax_probs, targets.astype(jnp.int8), alpha,
                        gamma=2.0, ignore_index=-100)
    out_i8 = jax.block_until_ready(out_i8)
    assert jnp.allclose(out_i8, ref, rtol=1e-5, atol=1e-6), (out_i8, ref)

    # bf16 probs: select chain stays bf16 in-kernel (loose tolerance: input precision)
    out_bf16 = focal_loss(softmax_probs.astype(jnp.bfloat16), targets, alpha,
                          gamma=2.0, ignore_index=-100)
    out_bf16 = jax.block_until_ready(out_bf16)
    assert jnp.isfinite(out_bf16) and abs(float(out_bf16) - float(ref)) < 0.1 * abs(float(ref)) + 1e-3, (
        out_bf16, ref)

    print("KERNEL_OK")
</pallas_src>

<mosaic_0001>
module attributes {stable_mosaic.version = 11 : i64} {
  func.func @_focal_loss_kernel(%arg0: i32, %arg1: i32, %arg2: memref<4xf32, #tpu.memory_space<smem>>, %arg3: memref<1x4x2x128xf32, #tpu.memory_space<vmem>>, %arg4: memref<1x2x128xi32, #tpu.memory_space<vmem>>, %arg5: memref<1x1x1x128xf32, #tpu.memory_space<vmem>>, %arg6: memref<1x1x1x128xf32, #tpu.memory_space<vmem>>) attributes {dimension_semantics = [#tpu.dimension_semantics<parallel>, #tpu.dimension_semantics<parallel>], iteration_bounds = array<i64: 2, 1>, scalar_prefetch = 0 : i64, scratch_operands = 0 : i64, tpu.core_type = #tpu.core_type<tc>, window_params = [{transform_indices = @transform_0, window_bounds = array<i64: 4>}, {transform_indices = @transform_1, window_bounds = array<i64: 1, 4, 2, 128>}, {transform_indices = @transform_2, window_bounds = array<i64: 1, 2, 128>}, {transform_indices = @transform_3, window_bounds = array<i64: 1, 1, 1, 128>}, {transform_indices = @transform_4, window_bounds = array<i64: 1, 1, 1, 128>}]} {
    %c0 = arith.constant 0 : index
    %c0_0 = arith.constant 0 : index
    %c0_1 = arith.constant 0 : index
    %0 = vector.load %arg4[%c0, %c0_0, %c0_1] : memref<1x2x128xi32, #tpu.memory_space<vmem>>, vector<1x2x128xi32>
    %1 = vector.shape_cast %0 : vector<1x2x128xi32> to vector<2x128xi32>
    %2 = tpu.iota {dimensions = array<i32: 0>} : vector<2x128xi32>
    %3 = tpu.iota {dimensions = array<i32: 1>} : vector<2x128xi32>
    %c2_i32 = arith.constant 2 : i32
    %4 = arith.muli %arg1, %c2_i32 : i32
    %5 = vector.broadcast %4 : i32 to vector<2x128xi32>
    %6 = arith.addi %5, %2 : vector<2x128xi32>
    %c128_i32 = arith.constant 128 : i32
    %7 = vector.broadcast %c128_i32 : i32 to vector<2x128xi32>
    %8 = arith.muli %6, %7 : vector<2x128xi32>
    %9 = arith.addi %8, %3 : vector<2x128xi32>
    %c256_i32 = arith.constant 256 : i32
    %10 = vector.broadcast %c256_i32 : i32 to vector<2x128xi32>
    %11 = arith.cmpi slt, %9, %10 : vector<2x128xi32>
    %c-100_i32 = arith.constant -100 : i32
    %12 = vector.broadcast %c-100_i32 : i32 to vector<2x128xi32>
    %13 = arith.cmpi ne, %1, %12 : vector<2x128xi32>
    %14 = arith.andi %11, %13 : vector<2x128xi1>
    %cst = arith.constant 1.000000e+00 : f32
    %15 = vector.broadcast %cst : f32 to vector<2x128xf32>
    %cst_2 = arith.constant 0.000000e+00 : f32
    %16 = vector.broadcast %cst_2 : f32 to vector<2x128xf32>
    %c0_i32 = arith.constant 0 : i32
    %17 = vector.broadcast %c0_i32 : i32 to vector<2x128xi32>
    %18 = arith.cmpi eq, %1, %17 : vector<2x128xi32>
    %c0_3 = arith.constant 0 : index
    %c0_4 = arith.constant 0 : index
    %c0_5 = arith.constant 0 : index
    %c0_6 = arith.constant 0 : index
    %19 = vector.load %arg3[%c0_3, %c0_4, %c0_5, %c0_6] : memref<1x4x2x128xf32, #tpu.memory_space<vmem>>, vector<1x1x2x128xf32>
    %20 = vector.shape_cast %19 : vector<1x1x2x128xf32> to vector<2x128xf32>
    %21 = arith.select %18, %20, %15 : vector<2x128xi1>, vector<2x128xf32>
    %c0_7 = arith.constant 0 : index
    %22 = memref.load %arg2[%c0_7] : memref<4xf32, #tpu.memory_space<smem>>
    %23 = vector.broadcast %22 : f32 to vector<2x128xf32>
    %24 = arith.select %18, %23, %16 : vector<2x128xi1>, vector<2x128xf32>
    %c1_i32 = arith.constant 1 : i32
    %25 = vector.broadcast %c1_i32 : i32 to vector<2x128xi32>
    %26 = arith.cmpi eq, %1, %25 : vector<2x128xi32>
    %c0_8 = arith.constant 0 : index
    %c1 = arith.constant 1 : index
    %c0_9 = arith.constant 0 : index
    %c0_10 = arith.constant 0 : index
    %27 = vector.load %arg3[%c0_8, %c1, %c0_9, %c0_10] : memref<1x4x2x128xf32, #tpu.memory_space<vmem>>, vector<1x1x2x128xf32>
    %28 = vector.shape_cast %27 : vector<1x1x2x128xf32> to vector<2x128xf32>
    %29 = arith.select %26, %28, %21 : vector<2x128xi1>, vector<2x128xf32>
    %c1_11 = arith.constant 1 : index
    %30 = memref.load %arg2[%c1_11] : memref<4xf32, #tpu.memory_space<smem>>
    %31 = vector.broadcast %30 : f32 to vector<2x128xf32>
    %32 = arith.select %26, %31, %24 : vector<2x128xi1>, vector<2x128xf32>
    %c2_i32_12 = arith.constant 2 : i32
    %33 = vector.broadcast %c2_i32_12 : i32 to vector<2x128xi32>
    %34 = arith.cmpi eq, %1, %33 : vector<2x128xi32>
    %c0_13 = arith.constant 0 : index
    %c2 = arith.constant 2 : index
    %c0_14 = arith.constant 0 : index
    %c0_15 = arith.constant 0 : index
    %35 = vector.load %arg3[%c0_13, %c2, %c0_14, %c0_15] : memref<1x4x2x128xf32, #tpu.memory_space<vmem>>, vector<1x1x2x128xf32>
    %36 = vector.shape_cast %35 : vector<1x1x2x128xf32> to vector<2x128xf32>
    %37 = arith.select %34, %36, %29 : vector<2x128xi1>, vector<2x128xf32>
    %c2_16 = arith.constant 2 : index
    %38 = memref.load %arg2[%c2_16] : memref<4xf32, #tpu.memory_space<smem>>
    %39 = vector.broadcast %38 : f32 to vector<2x128xf32>
    %40 = arith.select %34, %39, %32 : vector<2x128xi1>, vector<2x128xf32>
    %c3_i32 = arith.constant 3 : i32
    %41 = vector.broadcast %c3_i32 : i32 to vector<2x128xi32>
    %42 = arith.cmpi eq, %1, %41 : vector<2x128xi32>
    %c0_17 = arith.constant 0 : index
    %c3 = arith.constant 3 : index
    %c0_18 = arith.constant 0 : index
    %c0_19 = arith.constant 0 : index
    %43 = vector.load %arg3[%c0_17, %c3, %c0_18, %c0_19] : memref<1x4x2x128xf32, #tpu.memory_space<vmem>>, vector<1x1x2x128xf32>
    %44 = vector.shape_cast %43 : vector<1x1x2x128xf32> to vector<2x128xf32>
    %45 = arith.select %42, %44, %37 : vector<2x128xi1>, vector<2x128xf32>
    %c3_20 = arith.constant 3 : index
    %46 = memref.load %arg2[%c3_20] : memref<4xf32, #tpu.memory_space<smem>>
    %47 = vector.broadcast %46 : f32 to vector<2x128xf32>
    %48 = arith.select %42, %47, %40 : vector<2x128xi1>, vector<2x128xf32>
    %cst_21 = arith.constant 1.000000e-10 : f32
    %cst_22 = arith.constant 1.000000e+00 : f32
    %49 = vector.broadcast %cst_21 : f32 to vector<2x128xf32>
    %50 = arith.maximumf %49, %45 : vector<2x128xf32>
    %51 = vector.broadcast %cst_22 : f32 to vector<2x128xf32>
    %52 = arith.minimumf %51, %50 : vector<2x128xf32>
    %cst_23 = arith.constant 1.000000e+00 : f32
    %53 = vector.broadcast %cst_23 : f32 to vector<2x128xf32>
    %54 = arith.select %14, %52, %53 : vector<2x128xi1>, vector<2x128xf32>
    %55 = math.log %54 : vector<2x128xf32>
    %cst_24 = arith.constant 0.000000e+00 : f32
    %56 = vector.broadcast %cst_24 : f32 to vector<2x128xf32>
    %57 = arith.subf %56, %55 : vector<2x128xf32>
    %cst_25 = arith.constant 1.000000e+00 : f32
    %58 = vector.broadcast %cst_25 : f32 to vector<2x128xf32>
    %59 = arith.subf %58, %54 : vector<2x128xf32>
    %60 = arith.mulf %59, %59 : vector<2x128xf32>
    %61 = arith.mulf %48, %60 : vector<2x128xf32>
    %62 = arith.mulf %61, %57 : vector<2x128xf32>
    %cst_26 = arith.constant 0.000000e+00 : f32
    %63 = vector.broadcast %cst_26 : f32 to vector<2x128xf32>
    %64 = arith.select %14, %62, %63 : vector<2x128xi1>, vector<2x128xf32>
    %65 = arith.extui %14 : vector<2x128xi1> to vector<2x128xi32>
    %66 = arith.sitofp %65 : vector<2x128xi32> to vector<2x128xf32>
    %cst_27 = arith.constant dense<0.000000e+00> : vector<128xf32>
    %67 = vector.multi_reduction <add>, %64, %cst_27 [0] : vector<2x128xf32> to vector<128xf32>
    %68 = vector.shape_cast %67 : vector<128xf32> to vector<1x128xf32>
    %c0_28 = arith.constant 0 : index
    %c0_29 = arith.constant 0 : index
    %c0_30 = arith.constant 0 : index
    %c0_31 = arith.constant 0 : index
    %69 = vector.load %arg5[%c0_28, %c0_29, %c0_30, %c0_31] : memref<1x1x1x128xf32, #tpu.memory_space<vmem>>, vector<1x1x1x128xf32>
    %70 = vector.shape_cast %69 : vector<1x1x1x128xf32> to vector<1x128xf32>
    %71 = vector.shape_cast %68 : vector<1x128xf32> to vector<1x1x1x128xf32>
    tpu.vector_store %arg5[%c0_28, %c0_29, %c0_30, %c0_31], %71 {strides = array<i32>} : memref<1x1x1x128xf32, #tpu.memory_space<vmem>>, vector<1x1x1x128xf32>,
    %cst_32 = arith.constant dense<0.000000e+00> : vector<128xf32>
    %72 = vector.multi_reduction <add>, %66, %cst_32 [0] : vector<2x128xf32> to vector<128xf32>
    %73 = vector.shape_cast %72 : vector<128xf32> to vector<1x128xf32>
    %c0_33 = arith.constant 0 : index
    %c0_34 = arith.constant 0 : index
    %c0_35 = arith.constant 0 : index
    %c0_36 = arith.constant 0 : index
    %74 = vector.load %arg6[%c0_33, %c0_34, %c0_35, %c0_36] : memref<1x1x1x128xf32, #tpu.memory_space<vmem>>, vector<1x1x1x128xf32>
    %75 = vector.shape_cast %74 : vector<1x1x1x128xf32> to vector<1x128xf32>
    %76 = vector.shape_cast %73 : vector<1x128xf32> to vector<1x1x1x128xf32>
    tpu.vector_store %arg6[%c0_33, %c0_34, %c0_35, %c0_36], %76 {strides = array<i32>} : memref<1x1x1x128xf32, #tpu.memory_space<vmem>>, vector<1x1x1x128xf32>,
    return
  }
  func.func @transform_0(%arg0: i32, %arg1: i32) -> i32 {
    %c0_i32 = arith.constant 0 : i32
    %c0_i32_0 = arith.constant 0 : i32
    return %c0_i32 : i32
  }
  func.func @transform_1(%arg0: i32, %arg1: i32) -> (i32, i32, i32, i32) {
    %c0_i32 = arith.constant 0 : i32
    %c0_i32_0 = arith.constant 0 : i32
    %c0_i32_1 = arith.constant 0 : i32
    return %arg0, %c0_i32, %arg1, %c0_i32_0 : i32, i32, i32, i32
  }
  func.func @transform_2(%arg0: i32, %arg1: i32) -> (i32, i32, i32) {
    %c0_i32 = arith.constant 0 : i32
    %c0_i32_0 = arith.constant 0 : i32
    return %arg0, %arg1, %c0_i32 : i32, i32, i32
  }
  func.func @transform_3(%arg0: i32, %arg1: i32) -> (i32, i32, i32, i32) {
    %c0_i32 = arith.constant 0 : i32
    %c0_i32_0 = arith.constant 0 : i32
    %c0_i32_1 = arith.constant 0 : i32
    return %arg0, %arg1, %c0_i32, %c0_i32_0 : i32, i32, i32, i32
  }
  func.func @transform_4(%arg0: i32, %arg1: i32) -> (i32, i32, i32, i32) {
    %c0_i32 = arith.constant 0 : i32
    %c0_i32_0 = arith.constant 0 : i32
    %c0_i32_1 = arith.constant 0 : i32
    return %arg0, %arg1, %c0_i32, %c0_i32_0 : i32, i32, i32, i32
  }
}

</mosaic_0001>

<bundles_post_ra>
// kernel: tpu_custom_call.1
= control target key start
LH: loop header
LB: loop body
LE: loop exit
PB: predicated region body
PF: predicated region fallthrough
CT: control target
= control target key end

     0   :  { %10 = vsyncpa [#allocation5], 0  ;;  %s1080_s0 = inlined_call_operand.hbm [shape: f32[4], index: 0, kind: input, shape index: {}]   ;;  %s1081_s1 = inlined_call_operand.hbm [shape: f32[2,4,2,128], index: 1, kind: input, shape index: {}]   ;;  %s1082_s2 = inlined_call_operand.vmem [shape: s32[2,2,128], index: 2, kind: input, shape index: {}]   ;;  %s1083_s3 = inlined_call_operand.hbm [shape: f32[2,1,1,128], index: 3, kind: output, shape index: {0}]   ;;  %s1084_s4 = inlined_call_operand.hbm [shape: f32[2,1,1,128], index: 4, kind: output, shape index: {1}]  }
   0x1   :  { %11 = vsyncpa [#allocation3], 0 }
   0x2   :  { %13 = vsyncpa [#allocation3 + $0x1], 0 }
   0x3   :  { %14 = vsyncpa [#allocation4], 0 }
   0x4   :  { %16 = vsyncpa [#allocation4 + $0x1], 0 }
   0x5   :  { %17 = vsyncpa [#allocation9], 0 }
   0x6   :  { %19 = vsyncpa [#allocation9 + $0x1], 0  ;;  %s821_s15 = smov 0   ;;  %s823_s16 = smov 0  }
   0x7   :  { %s825_s17 = smov 0   ;;  %s827_s18 = smov 0  }
   0x8   :  { %s829_s19 = smov 0   ;;  %s831_s20 = smov 0  }
   0x9 LB: > { %s519_s21 = sadd.s32 4294967295, %s787_s20   ;;  %s520_s22 = sadd.s32 4294967294, %s787_s20   ;;  %s787_s20 = sphi %s831_s20, %s25_s20   ;;  %s783_s19 = sphi %s829_s19, %s1106_s19   ;;  %s779_s18 = sphi %s827_s18, %s1105_s18   ;;  %s775_s17 = sphi %s825_s17, %s1104_s17   ;;  %s771_s16 = sphi %s823_s16, %s1103_s16   ;;  %s767_s15 = sphi %s821_s15, %s1102_s15  }
   0xa   : > { %s67_s23 = sadd.s32 1, %s775_s17  ;;  %p74_p0 = scmp.ne.s32.totalorder %s775_s17, %s771_s16 }
   0xb   : > { %p75_p1 = scmp.eq.s32.totalorder %s787_s20, 0  ;;  %p80_p2 = scmp.ne.s32.totalorder %s771_s16, %s767_s15 }
   0xc   : > { %p859_p3 = scmp.eq.s32.totalorder %s519_s21, 0  ;;  %p134_p4 = scmp.eq.s32.totalorder %s519_s21, 1 }
   0xd   : > { %p76_p5 = por %p75_p1, %p74_p0  ;;  %p140_p6 = scmp.eq.s32.totalorder %s520_s22, 1 }
   0xe   : > { %s1089_s24 = scalar_select %p859_p3, 1, 0 }
   0xf   : > { %p865_p7 = por %p859_p3, %p80_p2  ;;  %p869_p8 = por %p134_p4, %p74_p0 }
  0x10   : > { %p873_p9 = por %p140_p6, %p80_p2  ;;  %p521_p10 = scmp.ge.s32.totalorder %s787_s20, 1 }
  0x11   : > { %s1090_s25 = scalar_select %p865_p7, 1, 0 }
  0x12   : > { %s1091_s26 = scalar_select %p869_p8, 1, 0 }
  0x13   : > { %s1092_s27 = scalar_select %p873_p9, 1, 0 }
  0x14   : > { %p175_p11 = scmp.lt.s32.totalorder %s787_s20, 3  ;;  %p569_p1 = scmp.lt.s32.totalorder %s787_s20, 2 }
  0x15   : > { %s197_s29 = sand.u32 1, %s775_s17   ;;  %s37_s5 = sadd.s32 1, %s783_s19 }
  0x16   : > { %p880_p13 = pnand %p521_p10, %p175_p11  ;;  %p888_p0 = pnand %p569_p1, %p76_p5 }
  0x17   : > { %s524_s6 = sshll.u32 %s197_s29, 3  ;;  %p39_p4 = scmp.ge.s32.totalorder %s37_s5, 2 }
  0x18   : > { %p553_p7 = pneg %p880_p13  ;;  %s626_s9 = scalar_lea.hbm %s1080_s0, 16 }
  0x19   : > { %p627_p6 = scmp.ne.s32.totalorder %s1080_s0, %s626_s9  ;;  %p633_p5 = scmp.lt.u32.totalorder %s626_s9, %s1080_s0 }
  0x1a   : > { %p554_p2 = pnand %p553_p7, %p859_p3 }
  0x1c   : > { %p628_p10 = pneg %p554_p2 }
  0x1e   : > { %p629_p11 = pnand %p628_p10, %p627_p6 }
  0x20   : > { %p630_p12 = pneg %p629_p11 }
  0x22   : > { %p635_p1 = pnand %p633_p5, %p630_p12 }
  0x24   : > { %638 = shalt.err (!%p635_p1)
}
  0x25   : > { %s789_s14 = smov [#allocation2]   ;;  %s1108_s5 = smov (%p39_p4, %s37_s5), 0 }
  0x26   : > { %556 = dma.hbm_to_smem (!%p554_p2), %s1080_s0, 16, %s789_s14, [#allocation5]  }
  0x27   : > { %s542_s7 = sshll.u32 %s783_s19, 7  ;;  %s62_s8 = ssub.s32 %s783_s19, %s1108_s5 }
  0x28   : > { %s915_s11 = scalar_lea.hbm %s1081_s1, %s542_s7  ;;  %p65_p7 = scmp.eq.s32.totalorder %s62_s8, 0 }
  0x29   : > { %s201_s12 = scalar_lea.vmem [#allocation6], %s524_s6  ;;  %s924_s21 = scalar_lea.sflag [#allocation3], %s197_s29 }
  0x2a   : > { %s209_s13 = sshll.u32 %s201_s12, 4  ;;  %s639_s22 = scalar_lea.hbm %s915_s11, 128  ;;  %s917_s13 = int_to_ptr.vmem [resolvable:$true] %s209_s13 }
  0x2b   : > { %s922_s14 = scalar_select %p65_p7, %s775_s17, %s67_s23  }
  0x2c   : > { %p640_p12 = scmp.ne.s32.totalorder %s915_s11, %s639_s22  ;;  %p641_p2 = pneg %p888_p0 }
  0x2d   : > { %s644_s6 = scalar_lea.hbm %s1081_s1, 256  ;;  %p645_p10 = scmp.lt.u32.totalorder %s915_s11, %s1081_s1 }
  0x2e   : > { %p642_p4 = pnand %p641_p2, %p640_p12  ;;  %p646_p11 = scmp.lt.u32.totalorder %s644_s6, %s639_s22 }
  0x2f   : > { %p648_p1 = scmp.lt.u32.totalorder %s639_s22, %s915_s11 }
  0x30   : > { %p643_p6 = pneg %p642_p4  ;;  %p647_p5 = por %p646_p11, %p645_p10 }
  0x32   : > { %p649_p7 = por %p648_p1, %p647_p5 }
  0x34   : > { %p650_p9 = pnand %p649_p7, %p643_p6 }
  0x36   : > { %653 = shalt.err (!%p650_p9)
}
  0x37   : > { %s654_s23 = scalar_lea.vmem %s917_s13, 128  ;;  %s790_s29 = smov [#allocation6]  }
  0x38   : > { %p655_p12 = scmp.ne.s32.totalorder %s917_s13, %s654_s23  ;;  %s659_s12 = sshll.u32 %s790_s29, 4  ;;  %s660_s12 = int_to_ptr.vmem [resolvable:$false] %s659_s12 }
  0x39   : > { %s661_s7 = scalar_lea.vmem %s660_s12, 256  ;;  %p662_p3 = scmp.lt.s32.totalorder %s917_s13, %s660_s12 }
  0x3a   : > { %p657_p4 = pnand %p655_p12, %p641_p2  ;;  %p663_p10 = scmp.lt.s32.totalorder %s661_s7, %s654_s23 }
  0x3c   : > { %p658_p8 = pneg %p657_p4  ;;  %p664_p11 = por %p663_p10, %p662_p3 }
  0x3e   : > { %p665_p5 = pnand %p664_p11, %p658_p8 }
  0x40   : > { %668 = shalt.err (!%p665_p5)
}
  0x41   : > { %s791_s22 = smov 32   ;;  %s792_s10 = smov 2  }
  0x42   : > { %560 = dma.hbm_to_vmem [thread:$0]  (!%p888_p0), %s915_s11, 128, %s917_s13, %s924_s21, %s791_s22, %s791_s22, %s792_s10  }
  0x43   : > { %231 = sbr.rel (%p880_p13) target bundleno = 153 (0x99), region = 32  ;;  %p1095_p9 = scmp.ne.s32.totalorder (!%p880_p13), %s1089_s24, 0 }
  0x4a   : > { %750 = dma.done.wait (%p1095_p9), [#allocation5], 16  }
  0x4b   : > { %752 = vsyncadd (%p1095_p9), [#allocation5], 4294967280  ;;  %s959_s6 = sand.u32 1, %s771_s16   ;;  %p1096_p3 = scmp.ne.s32.totalorder %s1090_s25, 0 }
  0x4c   : > { %s529_s8 = sshll.u32 %s959_s6, 3  ;;  %s238_s9 = scalar_lea.sflag [#allocation3], %s959_s6 }
  0x4d   : > { %s241_s23 = scalar_lea.vmem [#allocation6], %s529_s8 }
  0x4e   : > { %754 = dma.done.wait (%p1096_p3), %s238_s9, 128  }
  0x4f   : > { %756 = vsyncadd (%p1096_p3), %s238_s9, 4294967168 }
  0x50   : > { %246 = sfence }
  0x51   : > { %p277_p8 = scmp.lt.s32.totalorder %s779_s18, 1  ;;  %v285_v0 = vlaneseq  ;;  %v298_v4 = vld [vmem:[%s241_s23] sm:$0x3]  ;;  %s300_s21 = sld [smem:[#allocation2]]  ;;  %v531_v7 = vld [vmem:[%s241_s23 + $0x2] sm:$0x3] }
  0x52   : > { %s532_s25 = sld [smem:[#allocation2 + $0x1]]  ;;  %v533_v8 = vld [vmem:[%s241_s23 + $0x4] sm:$0x3]  ;;  %v535_v10 = vld [vmem:[%s241_s23 + $0x6] sm:$0x3]  ;;  %vm337_vm5 = vcmask 1041408  }
  0x53   : > { %s278_s24 = scalar_select %p277_p8, %s779_s18, 1  ;;  %v286_v1 = vshrl.u32 %v285_v0, 7  ;;  %v288_v2 = vand.u32 127, %v285_v0  ;;  %v793_v15 = vmov 0.0  }
  0x54   : > { %s534_s29 = sld [smem:[#allocation2 + $0x2]]  ;;  %s536_s12 = sld [smem:[#allocation2 + $0x3]] }
  0x55   : > { %s530_s28 = sshll.u32 %s278_s24, 1  ;;  %v292_v3 = vmul.u32 128, %v286_v1  ;;  %s276_s7 = scalar_lea.vmem [#allocation8], %s959_s6 }
  0x56   : > { %s283_s13 = scalar_lea.vmem %s1082_s2, %s530_s28  ;;  %s386_s22 = sshll.u32 %s276_s7, 4  ;;  %s990_s22 = int_to_ptr.vmem [resolvable:$true] %s386_s22 }
  0x57   : > { %v284_v5 = vld [vmem:[%s283_s13] sm:$0x3]  ;;  %v293_v6 = vadd.s32 %v292_v3, %v288_v2  ;;  %v301_v19 = vstv %s300_s21  ;;  %s538_s10 = sshll.u32 %s779_s18, 4  ;;  %s359_s24 = scalar_lea.sflag [#allocation9], %s959_s6 }
  0x58   : > { %vm295_vm0 = vcmp.ne.s32.totalorder %v284_v5, 4294967196  ;;  %vm297_vm1 = vcmp.eq.s32.totalorder %v284_v5, 0  ;;  %vm303_vm2 = vcmp.eq.s32.totalorder %v284_v5, 1  ;;  %vm310_vm4 = vcmp.eq.s32.totalorder %v284_v5, 2  ;;  %s997_s23 = scalar_lea.hbm %s1084_s4, %s538_s10  ;;  %s669_s28 = scalar_lea.vmem %s990_s22, 16 }
  0x59   : > { %vm294_vm3 = vcmp.lt.s32.totalorder %v293_v6, 256  ;;  %v299_v9 = vsel %vm297_vm1, %v298_v4, 1.0  ;;  %vm317_vm7 = vcmp.eq.s32.totalorder %v284_v5, 3  ;;  %v302_v23 = vsel %vm297_vm1, %v301_v19, 0.0  ;;  %p670_p13 = scmp.ne.s32.totalorder %s990_s22, %s669_s28  ;;  %p1099_p0 = scmp.ne.s32.totalorder %s1091_s26, 0 }
  0x5a   : > { %v306_v11 = vsel %vm303_vm2, %v531_v7, %v299_v9  ;;  %vm974_vm6 = vmand %vm294_vm3, %vm295_vm0  ;;  %v308_v24 = vstv %s532_s25  ;;  %v315_v28 = vstv %s534_s29  ;;  %v322_v33 = vstv %s536_s12  ;;  %s794_s30 = smov [#allocation8]  }
  0x5b   : > { %v313_v13 = vsel %vm310_vm4, %v533_v8, %v306_v11  ;;  %v537_v16 = vsel %vm974_vm6, 1.0, %v793_v15  ;;  %v309_v27 = vsel %vm303_vm2, %v308_v24, %v302_v23  ;;  %p671_p2 = pnand %p670_p13, %p1099_p0  ;;  %s673_s11 = sshll.u32 %s794_s30, 4  ;;  %s674_s11 = int_to_ptr.vmem [resolvable:$false] %s673_s11 }
  0x5c   : > { %v320_v14 = vsel %vm317_vm7, %v535_v10, %v313_v13  ;;  %v346_v18 = vsel %vm337_vm5, %v537_v16, 0.0  ;;  %v316_v32 = vsel %vm310_vm4, %v315_v28, %v309_v27  ;;  %s675_s13 = scalar_lea.vmem %s674_s11, 32  ;;  %p676_p1 = scmp.lt.s32.totalorder %s990_s22, %s674_s11 }
  0x5d   : > { %v324_v17 = vmax.f32 %v320_v14, 1e-10  ;;  %v347_v20 = vrot.slane %v346_v18, 4  ;;  %v323_v36 = vsel %vm317_vm7, %v322_v33, %v316_v32  ;;  %p672_p6 = pneg %p671_p2  ;;  %p677_p7 = scmp.lt.s32.totalorder %s675_s13, %s669_s28 }
  0x5f   : > { %v325_v21 = vmin.f32 %v324_v17, 1.0  ;;  %v348_v22 = vadd.f32 %v347_v20, %v346_v18  ;;  %p678_p12 = por %p677_p7, %p676_p1 }
  0x61   : > { %v326_v25 = vsel %vm974_vm6, %v325_v21, 1.0  ;;  %v349_v26 = vrot.slane %v348_v22, 2  ;;  %p679_p4 = pnand %p678_p12, %p672_p6 }
  0x62   : > { %624 = vlog2.f32 %v326_v25  ;;  %v330_v30 = vsub.f32 1.0, %v326_v25 }
  0x63   : > { %v350_v29 = vadd.f32 %v349_v26, %v348_v22 }
  0x64   : > { %v331_v35 = vmul.f32 %v330_v30, %v330_v30 }
  0x65   : > { %v351_v31 = vrot.slane %v350_v29, 1 }
  0x67   : > { %v352_v34 = vadd.f32 %v351_v31, %v350_v29 }
  0x69   : > { %353 = vst [vmem:[%s276_s7] sm:$0x1] %v352_v34 }
  0x6a   : > { %682 = shalt.err (!%p679_p4)
}
  0x6b   : > { %s683_s21 = scalar_lea.hbm %s997_s23, 16  ;;  %s687_s12 = scalar_lea.hbm %s1084_s4, 32 }
  0x6c   : > { %p684_p10 = scmp.ne.s32.totalorder %s997_s23, %s683_s21  ;;  %p688_p9 = scmp.lt.u32.totalorder %s997_s23, %s1084_s4 }
  0x6d   : > { %p689_p3 = scmp.lt.u32.totalorder %s687_s12, %s683_s21  ;;  %p691_p13 = scmp.lt.u32.totalorder %s683_s21, %s997_s23 }
  0x6e   : > { %p685_p11 = pnand %p684_p10, %p1099_p0 }
  0x6f   : > { %p690_p8 = por %p689_p3, %p688_p9 }
  0x70   : > { %p686_p5 = pneg %p685_p11 }
  0x71   : > { %p692_p2 = por %p691_p13, %p690_p8 }
  0x73   : > { %p693_p6 = pnand %p692_p2, %p686_p5 }
  0x75   : > { %696 = shalt.err (!%p693_p6)
}
  0x76   : > { %550 = dma.vmem_to_hbm [thread:$0]  (%p1099_p0), %s990_s22, 16, %s997_s23, %s359_s24   ;;  %v625_v37 = vpop.eup %624  ;;  %v332_v39 = vmul.f32 %v331_v35, %v323_v36 }
  0x77   : > { %v328_v38 = vmul.f32 0.6931472, %v625_v37  ;;  %s270_s9 = scalar_lea.vmem [#allocation7], %s959_s6  ;;  %s1033_s24 = scalar_lea.hbm %s1083_s3, %s538_s10 }
  0x78   : > { %s372_s28 = sshll.u32 %s270_s9, 4  ;;  %s355_s30 = scalar_lea.sflag [#allocation4], %s959_s6  ;;  %s1026_s28 = int_to_ptr.vmem [resolvable:$true] %s372_s28 }
  0x79   : > { %v329_v40 = vsub.f32 0.0, %v328_v38  ;;  %s697_s11 = scalar_lea.vmem %s1026_s28, 16  ;;  %s795_s13 = smov [#allocation7]  }
  0x7a   : > { %p698_p1 = scmp.ne.s32.totalorder %s1026_s28, %s697_s11  ;;  %s701_s21 = sshll.u32 %s795_s13, 4  ;;  %s702_s21 = int_to_ptr.vmem [resolvable:$false] %s701_s21 }
  0x7b   : > { %v333_v41 = vmul.f32 %v332_v39, %v329_v40  ;;  %s703_s25 = scalar_lea.vmem %s702_s21, 32  ;;  %p704_p4 = scmp.lt.s32.totalorder %s1026_s28, %s702_s21 }
  0x7c   : > { %p699_p7 = pnand %p698_p1, %p1099_p0  ;;  %p705_p10 = scmp.lt.s32.totalorder %s703_s25, %s697_s11 }
  0x7d   : > { %v334_v42 = vsel %vm974_vm6, %v333_v41, 0.0 }
  0x7e   : > { %v338_v43 = vsel %vm337_vm5, %v334_v42, 0.0  ;;  %p700_p12 = pneg %p699_p7  ;;  %p706_p11 = por %p705_p10, %p704_p4 }
  0x7f   : > { %v339_v44 = vrot.slane %v338_v43, 4 }
  0x80   : > { %p707_p5 = pnand %p706_p11, %p700_p12 }
  0x81   : > { %v340_v45 = vadd.f32 %v339_v44, %v338_v43 }
  0x83   : > { %v341_v46 = vrot.slane %v340_v45, 2 }
  0x85   : > { %v342_v47 = vadd.f32 %v341_v46, %v340_v45 }
  0x87   : > { %v343_v48 = vrot.slane %v342_v47, 1 }
  0x89   : > { %v344_v49 = vadd.f32 %v343_v48, %v342_v47 }
  0x8b   : > { %345 = vst [vmem:[%s270_s9] sm:$0x1] %v344_v49 }
  0x8c   : > { %710 = shalt.err (!%p707_p5)
}
  0x8d   : > { %s711_s18 = scalar_lea.hbm %s1033_s24, 16  ;;  %s715_s29 = scalar_lea.hbm %s1083_s3, 32 }
  0x8e   : > { %p712_p9 = scmp.ne.s32.totalorder %s1033_s24, %s711_s18  ;;  %p716_p13 = scmp.lt.u32.totalorder %s1033_s24, %s1083_s3 }
  0x8f   : > { %p717_p2 = scmp.lt.u32.totalorder %s715_s29, %s711_s18  ;;  %p719_p1 = scmp.lt.u32.totalorder %s711_s18, %s1033_s24 }
  0x90   : > { %p713_p3 = pnand %p712_p9, %p1099_p0 }
  0x91   : > { %p718_p6 = por %p717_p2, %p716_p13 }
  0x92   : > { %p714_p8 = pneg %p713_p3 }
  0x93   : > { %p720_p7 = por %p719_p1, %p718_p6 }
  0x95   : > { %p721_p12 = pnand %p720_p7, %p714_p8 }
  0x97   : > { %724 = shalt.err (!%p721_p12)
}
  0x98   : > { %549 = dma.vmem_to_hbm [thread:$0]  (%p1099_p0), %s1026_s28, 16, %s1033_s24, %s355_s30  }
  0x99 PF: > { %s398_s8 = sand.u32 1, %s767_s15   ;;  %p1100_p4 = scmp.ne.s32.totalorder %s1092_s27, 0 }
  0x9a   : > { %p1101_p10 = scmp.ge.s32.totalorder %s787_s20, 2  ;;  %s399_s9 = scalar_lea.sflag [#allocation4], %s398_s8 }
  0x9c   : > { %p562_p11 = pnand %p1101_p10, %p1100_p4 }
  0x9e   : > { %758 = dma.done.wait (!%p562_p11), %s399_s9, 16  }
  0x9f   : > { %760 = vsyncadd (!%p562_p11), %s399_s9, 4294967280  ;;  %s407_s22 = scalar_lea.sflag [#allocation9], %s398_s8 }
  0xa0   : > { %762 = dma.done.wait (!%p562_p11), %s407_s22, 16  }
  0xa1   : > { %764 = vsyncadd (!%p562_p11), %s407_s22, 4294967280  ;;  %s25_s20 = sadd.s32 1, %s787_s20   ;;  %s1102_s15 = smov %s771_s16 }
  0xa2   : > { %p22_p5 = scmp.ge.s32.totalorder %s25_s20, 4   ;;  %s1103_s16 = smov %s775_s17 }
  0xa3   : > { %s1104_s17 = smov %s922_s14  ;;  %s1105_s18 = smov %s783_s19 }
  0xa4   : > { %s1106_s19 = smov %s1108_s5  ;;  %24 = sbr.rel (!%p22_p5) target bundleno = 9 (0x9), region = 105 }
  0xab   :  { %411 = vsyncpa [#allocation3], 1 }
  0xac   :  { %413 = vsyncpa [#allocation3 + $0x1], 1 }
  0xad   :  { %414 = vsyncpa [#allocation4], 1 }
  0xae   :  { %416 = vsyncpa [#allocation4 + $0x1], 1 }
  0xaf   :  { %417 = vsyncpa [#allocation9], 1 }
  0xb0   :  { %419 = vsyncpa [#allocation9 + $0x1], 1 }
  0xb1   :  { %420 = vsyncpa [#allocation5], 1 }
  0xb2   :  { %422 = vsyncpa [#allocation5 + $0x1], 1 }

</bundles_post_ra>
